<compile_context>
chip_gen: v7x
topology: tpu7x:2x2x1
jax: 0.10.0
libtpu: 0.0.40
codegen_flags: <defaults>
</compile_context>

<pallas_src>
import functools

import jax
import jax.numpy as jnp
from jax.experimental import pallas as pl
from jax.experimental.pallas import tpu as pltpu

_VMEM_LIMIT_BYTES = 32 * 1024 * 1024          # explicit scoped-VMEM budget (safe on v5e/v6e/v7x)
_H_RESIDENT_BUDGET_BYTES = 20 * 1024 * 1024   # keep H fully VMEM-resident below this estimate


# ---------------------------------------------------------------------------
# tiling / padding helpers
# ---------------------------------------------------------------------------
def _round_up(x, m):
    return ((x + m - 1) // m) * m


def _pad_dim(d, tile_pref):
    """Padded size & tile for a lane-aligned dim: multiples of 128, tile | padded."""
    assert tile_pref % 128 == 0
    if d <= tile_pref:
        p = _round_up(d, 128)
        return p, p
    p = _round_up(d, tile_pref)
    return p, tile_pref


def _choose_node_tiles(n, row_pref, red_pref):
    """Padded node count plus (row tile, reduction tile); all multiples of 128."""
    assert row_pref % 128 == 0 and red_pref % 128 == 0
    big = max(row_pref, red_pref)
    assert big % min(row_pref, red_pref) == 0
    if n <= big:
        n_pad = _round_up(n, 128)
        tm = row_pref if n_pad % row_pref == 0 else n_pad
        tk = red_pref if n_pad % red_pref == 0 else n_pad
    else:
        n_pad = _round_up(n, big)
        tm, tk = row_pref, red_pref
    # v7x megacore: prefer >= 2 row tiles so the "parallel" rows axis feeds both TCs.
    if tm == n_pad and n_pad >= 256 and (n_pad // 2) % 128 == 0:
        tm = n_pad // 2
    return n_pad, tm, tk


def _pad2(x, rows, cols):
    pr, pc = rows - x.shape[0], cols - x.shape[1]
    if pr == 0 and pc == 0:
        return x
    return jnp.pad(x, ((0, pr), (0, pc)))


# ---------------------------------------------------------------------------
# kernel 1: H = X @ W  (bf16 MXU, f32 acc, bf16 lane-dense output)
#           optionally writes an all-ones "degree" column into H's lane padding
# ---------------------------------------------------------------------------
def _matmul_kernel(x_ref, w_ref, h_ref, acc_ref, *, deg_block_j, deg_col_in_block):
    last_k = pl.num_programs(2) - 1

    @pl.when(pl.program_id(2) == 0)
    def _():
        acc_ref[...] = jnp.zeros_like(acc_ref)

    acc_ref[...] += jnp.dot(x_ref[...], w_ref[...],
                            preferred_element_type=jnp.float32)

    @pl.when(pl.program_id(2) == last_k)
    def _():
        h_ref[...] = acc_ref[...].astype(h_ref.dtype)

    if deg_block_j is not None:
        # The aggregation matmul then yields the degree in acc[:, f_out] for free.
        @pl.when((pl.program_id(2) == last_k) & (pl.program_id(1) == deg_block_j))
        def _():
            lane = jax.lax.broadcasted_iota(jnp.int32, acc_ref.shape, 1)
            h_ref[...] = jnp.where(lane == deg_col_in_block,
                                   jnp.float32(1.0),
                                   acc_ref[...]).astype(h_ref.dtype)


# ---------------------------------------------------------------------------
# kernel 2a: resident-H aggregation: out = norm(A_eff @ H) [+ relu]
#            grid = (row tiles, reduction tiles); H fetched from HBM once.
# ---------------------------------------------------------------------------
def _aggregate_resident_kernel(a_ref, h_ref, o_ref, acc_ref, *,
                               tk, reverse, norm, relu, deg_col):
    k = pl.program_id(1)

    @pl.when(k == 0)
    def _():
        acc_ref[...] = jnp.zeros_like(acc_ref)

    # int8 0/1 adjacency -> bf16 MXU feed (via f32: both converts always lower).
    a = a_ref[...].astype(jnp.float32).astype(jnp.bfloat16)

    row0 = pl.multiple_of(k * tk, tk)
    h_blk = h_ref[pl.ds(row0, tk), :]                       # (tk, fo_pad)

    if reverse:
        # a was fetched as the (k, i) block of adj; contract over axis 0 so the
        # MXU consumes the transposed tile natively (no in-kernel XLU transpose).
        acc_ref[...] += jax.lax.dot_general(
            a, h_blk, dimension_numbers=(((0,), (0,)), ((), ())),
            preferred_element_type=jnp.float32)
    else:
        acc_ref[...] += jnp.dot(a, h_blk, preferred_element_type=jnp.float32)

    @pl.when(k == pl.num_programs(1) - 1)
    def _():
        out = acc_ref[...]
        if norm:
            deg = out[:, deg_col:deg_col + 1]               # degree rode the MXU matmul
            dinv = jnp.where(deg > 0.0, 1.0 / jnp.maximum(deg, 1.0), 0.0)
            out = out * dinv
        if relu:
            out = jnp.maximum(out, 0.0)
        o_ref[...] = out.astype(o_ref.dtype)


# ---------------------------------------------------------------------------
# kernel 2b: F_out-tiled aggregation (wide F_out / small VMEM fallback);
#            dinv is precomputed once per layer and streamed as a (tm, 1) block.
# ---------------------------------------------------------------------------
def _aggregate_tiled_kernel(dinv_ref, a_ref, h_ref, o_ref, acc_ref, *,
                            reverse, norm, relu):
    k = pl.program_id(2)

    @pl.when(k == 0)
    def _():
        acc_ref[...] = jnp.zeros_like(acc_ref)

    a = a_ref[...].astype(jnp.float32).astype(jnp.bfloat16)
    if reverse:
        acc_ref[...] += jax.lax.dot_general(
            a, h_ref[...], dimension_numbers=(((0,), (0,)), ((), ())),
            preferred_element_type=jnp.float32)
    else:
        acc_ref[...] += jnp.dot(a, h_ref[...], preferred_element_type=jnp.float32)

    @pl.when(k == pl.num_programs(2) - 1)
    def _():
        out = acc_ref[...]
        if norm:
            out = out * dinv_ref[...]
        if relu:
            out = jnp.maximum(out, 0.0)
        o_ref[...] = out.astype(o_ref.dtype)


# ---------------------------------------------------------------------------
# one GCN layer on pre-padded operands (keeps everything padded / bf16-friendly)
# ---------------------------------------------------------------------------
def _gcn_layer_padded(x_pad, weight, a_pad, *, n_pad, tm, tk, reverse, norm, relu,
                      out_dtype, block_fin, block_fout,
                      h_resident_budget_bytes, vmem_limit_bytes):
    """x_pad: (n_pad, >=f_in) bf16; weight: (f_in, f_out) f32; a_pad: (n_pad, n_pad) int8."""
    assert x_pad.shape[0] == n_pad and x_pad.dtype == jnp.bfloat16
    assert a_pad.shape == (n_pad, n_pad) and a_pad.dtype == jnp.int8
    f_in, f_out = weight.shape
    assert f_in <= x_pad.shape[1]

    fi_pad, tfi = _pad_dim(x_pad.shape[1], block_fin)

    # Resident-H decision (degree ones-column lives in H's lane padding).
    fo_pad_res, tfo_res = _pad_dim(f_out + (1 if norm else 0), block_fout)
    out_itemsize = 2 if out_dtype == jnp.bfloat16 else 4
    resident_est = (2 * n_pad * fo_pad_res * 2          # double-buffered bf16 H
                    + 2 * tm * tk                       # double-buffered int8 A tile
                    + tm * fo_pad_res * 4               # f32 accumulator
                    + 2 * tm * fo_pad_res * out_itemsize)
    h_resident = resident_est <= h_resident_budget_bytes
    if h_resident:
        fo_pad, tfo = fo_pad_res, tfo_res
        use_deg_col = norm
    else:
        fo_pad, tfo = _pad_dim(f_out, block_fout)
        use_deg_col = False

    x_p = _pad2(x_pad, n_pad, fi_pad)
    w_p = _pad2(weight.astype(jnp.bfloat16), fi_pad, fo_pad)

    # ---- H = X @ W (computed once, stored bf16, lane-dense) ----
    h = pl.pallas_call(
        functools.partial(
            _matmul_kernel,
            deg_block_j=(f_out // tfo) if use_deg_col else None,
            deg_col_in_block=(f_out % tfo) if use_deg_col else 0),
        out_shape=jax.ShapeDtypeStruct((n_pad, fo_pad), jnp.bfloat16),
        grid=(n_pad // tm, fo_pad // tfo, fi_pad // tfi),
        in_specs=[
            pl.BlockSpec((tm, tfi), lambda i, j, k: (i, k)),
            pl.BlockSpec((tfi, tfo), lambda i, j, k: (k, j)),
        ],
        out_specs=pl.BlockSpec((tm, tfo), lambda i, j, k: (i, j)),
        scratch_shapes=[pltpu.VMEM((tm, tfo), jnp.float32)],
        compiler_params=pltpu.CompilerParams(
            dimension_semantics=("parallel", "parallel", "arbitrary"),
            vmem_limit_bytes=vmem_limit_bytes),
    )(x_p, w_p)

    # ---- aggregation: out = norm(A_eff @ H) [+ relu] ----
    if h_resident:
        if reverse:
            a_spec = pl.BlockSpec((tk, tm), lambda i, k: (k, i))
        else:
            a_spec = pl.BlockSpec((tm, tk), lambda i, k: (i, k))
        out = pl.pallas_call(
            functools.partial(_aggregate_resident_kernel, tk=tk, reverse=reverse,
                              norm=norm, relu=relu,
                              deg_col=f_out if norm else None),
            out_shape=jax.ShapeDtypeStruct((n_pad, fo_pad), out_dtype),
            grid=(n_pad // tm, n_pad // tk),
            in_specs=[
                a_spec,
                # full-extent block, constant index -> H DMA'd from HBM exactly once
                pl.BlockSpec((n_pad, fo_pad), lambda i, k: (0, 0)),
            ],
            out_specs=pl.BlockSpec((tm, fo_pad), lambda i, k: (i, 0)),
            scratch_shapes=[pltpu.VMEM((tm, fo_pad), jnp.float32)],
            compiler_params=pltpu.CompilerParams(
                dimension_semantics=("parallel", "arbitrary"),
                vmem_limit_bytes=vmem_limit_bytes),
        )(a_pad, h)
    else:
        # F_out-tiled fallback: precompute dinv once (A is identical across layers,
        # so this one-off reduction is amortized over the re-read of A).
        if norm:
            deg = jnp.sum(a_pad.astype(jnp.float32),
                          axis=0 if reverse else 1).reshape(n_pad, 1)
            dinv = jnp.where(deg > 0.0, 1.0 / jnp.maximum(deg, 1.0), 0.0)
        else:
            dinv = jnp.ones((n_pad, 1), jnp.float32)
        if reverse:
            a_spec = pl.BlockSpec((tk, tm), lambda i, j, k: (k, i))
        else:
            a_spec = pl.BlockSpec((tm, tk), lambda i, j, k: (i, k))
        out = pl.pallas_call(
            functools.partial(_aggregate_tiled_kernel, reverse=reverse,
                              norm=norm, relu=relu),
            out_shape=jax.ShapeDtypeStruct((n_pad, fo_pad), out_dtype),
            grid=(n_pad // tm, fo_pad // tfo, n_pad // tk),
            in_specs=[
                pl.BlockSpec((tm, 1), lambda i, j, k: (i, 0)),     # dinv
                a_spec,
                pl.BlockSpec((tk, tfo), lambda i, j, k: (k, j)),   # H feature tile
            ],
            out_specs=pl.BlockSpec((tm, tfo), lambda i, j, k: (i, j)),
            scratch_shapes=[pltpu.VMEM((tm, tfo), jnp.float32)],
            compiler_params=pltpu.CompilerParams(
                dimension_semantics=("parallel", "parallel", "arbitrary"),
                vmem_limit_bytes=vmem_limit_bytes),
        )(dinv, a_pad, h)

    return out  # padded (n_pad, fo_pad)


# ---------------------------------------------------------------------------
# public wrappers
# ---------------------------------------------------------------------------
def gcn_layer(features, weight, adj, *, reverse=False, norm=True, relu=False,
              block_rows=512, block_red=1024, block_fin=512, block_fout=512,
              h_resident_budget_bytes=_H_RESIDENT_BUDGET_BYTES,
              vmem_limit_bytes=_VMEM_LIMIT_BYTES):
    """features: (N, F_in) f32; weight: (F_in, F_out) f32; adj: (N, N) dense 0/1."""
    n, f_in = features.shape
    assert weight.shape[0] == f_in and adj.shape == (n, n)
    n_pad, tm, tk = _choose_node_tiles(n, block_rows, block_red)
    a_p = _pad2(adj.astype(jnp.int8), n_pad, n_pad)            # 0/1 exact in int8
    x_p = _pad2(features.astype(jnp.bfloat16), n_pad, f_in)
    out = _gcn_layer_padded(x_p, weight, a_p, n_pad=n_pad, tm=tm, tk=tk,
                            reverse=reverse, norm=norm, relu=relu,
                            out_dtype=jnp.float32,
                            block_fin=block_fin, block_fout=block_fout,
                            h_resident_budget_bytes=h_resident_budget_bytes,
                            vmem_limit_bytes=vmem_limit_bytes)
    return out[:n, :weight.shape[1]]


def gcn_forward(features, w1, w2, adj, *, block_rows=512, block_red=1024,
                block_fin=512, block_fout=512,
                h_resident_budget_bytes=_H_RESIDENT_BUDGET_BYTES,
                vmem_limit_bytes=_VMEM_LIMIT_BYTES):
    """GCN.forward: layer1 -> relu -> layer2 (relu fused; intermediate stays padded bf16)."""
    n, f_in = features.shape
    assert w1.shape[0] == f_in and w2.shape[0] == w1.shape[1] and adj.shape == (n, n)
    n_pad, tm, tk = _choose_node_tiles(n, block_rows, block_red)
    a_p = _pad2(adj.astype(jnp.int8), n_pad, n_pad)            # stored once, shared by both layers
    x_p = _pad2(features.astype(jnp.bfloat16), n_pad, f_in)
    kw = dict(n_pad=n_pad, tm=tm, tk=tk, block_fin=block_fin, block_fout=block_fout,
              h_resident_budget_bytes=h_resident_budget_bytes,
              vmem_limit_bytes=vmem_limit_bytes)
    h1 = _gcn_layer_padded(x_p, w1, a_p, reverse=False, norm=True, relu=True,
                           out_dtype=jnp.bfloat16, **kw)       # padded bf16, fed directly
    out = _gcn_layer_padded(h1, w2, a_p, reverse=False, norm=True, relu=False,
                            out_dtype=jnp.float32, **kw)
    return out[:n, :w2.shape[1]]


# ---------------------------------------------------------------------------
# init + pure-JAX reference (mirrors the kernel's bf16 casts)
# ---------------------------------------------------------------------------
def kaiming_uniform_init(key, in_feats, out_feats):
    # nn.init.kaiming_uniform_(W, nonlinearity='relu') on an (in_feats, out_feats)
    # tensor: fan_in = W.size(1) = out_feats, bound = sqrt(6 / out_feats).
    bound = (6.0 / out_feats) ** 0.5
    return jax.random.uniform(key, (in_feats, out_feats), jnp.float32,
                              minval=-bound, maxval=bound)


def ref_gcn_layer(features, weight, adj, *, reverse=False, norm=True, relu=False):
    xb = features.astype(jnp.bfloat16).astype(jnp.float32)
    wb = weight.astype(jnp.bfloat16).astype(jnp.float32)
    h = (xb @ wb).astype(jnp.bfloat16).astype(jnp.float32)
    a = (adj.T if reverse else adj).astype(jnp.float32)
    agg = a @ h
    if norm:
        deg = jnp.sum(a, axis=1, keepdims=True)
        dinv = jnp.where(deg > 0, 1.0 / jnp.maximum(deg, 1.0), 0.0)
        agg = agg * dinv
    if relu:
        agg = jnp.maximum(agg, 0.0)
    return agg


if __name__ == "__main__":
    key = jax.random.PRNGKey(0)
    k_x, k_w1, k_w2, k_a = jax.random.split(key, 4)

    N = 200          # nodes (padded to 256 internally)
    IN_FEATS = 16
    HIDDEN = 32
    NUM_CLASSES = 8

    features = jax.random.normal(k_x, (N, IN_FEATS), jnp.float32)
    w1 = kaiming_uniform_init(k_w1, IN_FEATS, HIDDEN)
    w2 = kaiming_uniform_init(k_w2, HIDDEN, NUM_CLASSES)

    # Deterministic synthetic directed graph as a dense 0/1 adjacency matrix.
    adj = (jax.random.uniform(k_a, (N, N)) < 0.05).astype(jnp.float32)
    adj = adj * (1.0 - jnp.eye(N, dtype=jnp.float32))  # no self loops

    # Small tiles so this tiny demo still exercises a (2, 2) rows x reduction grid.
    tiles = dict(block_rows=128, block_red=128)

    out = jax.block_until_ready(gcn_forward(features, w1, w2, adj, **tiles))
    assert out.shape == (N, NUM_CLASSES)

    # End-to-end reference (same math / same bf16 casts, outside Pallas).
    h1_ref = ref_gcn_layer(features, w1, adj, relu=True)
    ref = ref_gcn_layer(h1_ref, w2, adj, relu=False)
    assert jnp.allclose(out, ref, atol=2e-3, rtol=2e-3), (
        float(jnp.max(jnp.abs(out - ref))))

    # Production (default) tile sizes.
    out_d = jax.block_until_ready(gcn_forward(features, w1, w2, adj))
    assert jnp.allclose(out_d, ref, atol=2e-3, rtol=2e-3)

    # Reverse (A^T) path: transposed tile consumed natively by the MXU.
    out_rev = jax.block_until_ready(
        gcn_layer(features, w1, adj, reverse=True, norm=True, relu=False, **tiles))
    ref_rev = ref_gcn_layer(features, w1, adj, reverse=True)
    assert jnp.allclose(out_rev, ref_rev, atol=2e-3, rtol=2e-3)

    # F_out-tiled fallback path (forced by disabling the resident-H budget).
    out_t = jax.block_until_ready(
        gcn_layer(features, w1, adj, norm=True, relu=True,
                  h_resident_budget_bytes=0, **tiles))
    assert jnp.allclose(out_t, h1_ref, atol=2e-3, rtol=2e-3)

    print("KERNEL_OK")
</pallas_src>

<mosaic_0001>
module attributes {stable_mosaic.version = 11 : i64} {
  func.func @_matmul_kernel(%arg0: i32, %arg1: i32, %arg2: i32, %arg3: memref<128x128xbf16, #tpu.memory_space<vmem>>, %arg4: memref<128x128xbf16, #tpu.memory_space<vmem>>, %arg5: memref<128x128xbf16, #tpu.memory_space<vmem>>, %arg6: memref<128x128xf32, #tpu.memory_space<vmem>>) attributes {dimension_semantics = [#tpu.dimension_semantics<parallel>, #tpu.dimension_semantics<parallel>, #tpu.dimension_semantics<arbitrary>], iteration_bounds = array<i64: 2, 1, 1>, scalar_prefetch = 0 : i64, scratch_operands = 1 : i64, tpu.core_type = #tpu.core_type<tc>, window_params = [{transform_indices = @transform_0, window_bounds = array<i64: 128, 128>}, {transform_indices = @transform_1, window_bounds = array<i64: 128, 128>}, {transform_indices = @transform_2, window_bounds = array<i64: 128, 128>}]} {
    %c0_i32 = arith.constant 0 : i32
    %0 = arith.cmpi eq, %arg2, %c0_i32 : i32
    %1 = arith.extui %0 : i1 to i32
    %c0_i32_0 = arith.constant 0 : i32
    %2 = arith.cmpi ne, %1, %c0_i32_0 : i32
    scf.if %2 {
      %cst_13 = arith.constant 0.000000e+00 : f32
      %17 = vector.broadcast %cst_13 : f32 to vector<128x128xf32>
      %c0_14 = arith.constant 0 : index
      %c0_15 = arith.constant 0 : index
      %18 = vector.load %arg6[%c0_14, %c0_15] : memref<128x128xf32, #tpu.memory_space<vmem>>, vector<128x128xf32>
      tpu.vector_store %arg6[%c0_14, %c0_15], %17 {strides = array<i32>} : memref<128x128xf32, #tpu.memory_space<vmem>>, vector<128x128xf32>,
    } else {
    }
    %c0 = arith.constant 0 : index
    %c0_1 = arith.constant 0 : index
    %3 = vector.load %arg6[%c0, %c0_1] : memref<128x128xf32, #tpu.memory_space<vmem>>, vector<128x128xf32>
    %c0_2 = arith.constant 0 : index
    %c0_3 = arith.constant 0 : index
    %4 = vector.load %arg3[%c0_2, %c0_3] : memref<128x128xbf16, #tpu.memory_space<vmem>>, vector<128x128xbf16>
    %c0_4 = arith.constant 0 : index
    %c0_5 = arith.constant 0 : index
    %5 = vector.load %arg4[%c0_4, %c0_5] : memref<128x128xbf16, #tpu.memory_space<vmem>>, vector<128x128xbf16>
    %cst = arith.constant dense<0.000000e+00> : vector<128x128xf32>
    %6 = tpu.matmul %4, %5, %cst {dimension_numbers = #tpu.dot_dimension_numbers<[1], [0], [0], [1], [0, 0, 1, 1], [], []>} : vector<128x128xbf16>, vector<128x128xbf16>, vector<128x128xf32> -> vector<128x128xf32>
    %7 = arith.addf %3, %6 : vector<128x128xf32>
    %c0_6 = arith.constant 0 : index
    %c0_7 = arith.constant 0 : index
    %8 = vector.load %arg6[%c0_6, %c0_7] : memref<128x128xf32, #tpu.memory_space<vmem>>, vector<128x128xf32>
    tpu.vector_store %arg6[%c0_6, %c0_7], %7 {strides = array<i32>} : memref<128x128xf32, #tpu.memory_space<vmem>>, vector<128x128xf32>,
    %c0_i32_8 = arith.constant 0 : i32
    %9 = arith.cmpi eq, %arg2, %c0_i32_8 : i32
    %10 = arith.extui %9 : i1 to i32
    %c0_i32_9 = arith.constant 0 : i32
    %11 = arith.cmpi ne, %10, %c0_i32_9 : i32
    scf.if %11 {
      %c0_13 = arith.constant 0 : index
      %c0_14 = arith.constant 0 : index
      %17 = vector.load %arg6[%c0_13, %c0_14] : memref<128x128xf32, #tpu.memory_space<vmem>>, vector<128x128xf32>
      %18 = arith.truncf %17 : vector<128x128xf32> to vector<128x128xbf16>
      %c0_15 = arith.constant 0 : index
      %c0_16 = arith.constant 0 : index
      %19 = vector.load %arg5[%c0_15, %c0_16] : memref<128x128xbf16, #tpu.memory_space<vmem>>, vector<128x128xbf16>
      tpu.vector_store %arg5[%c0_15, %c0_16], %18 {strides = array<i32>} : memref<128x128xbf16, #tpu.memory_space<vmem>>, vector<128x128xbf16>,
    } else {
    }
    %c0_i32_10 = arith.constant 0 : i32
    %12 = arith.cmpi eq, %arg2, %c0_i32_10 : i32
    %c0_i32_11 = arith.constant 0 : i32
    %13 = arith.cmpi eq, %arg1, %c0_i32_11 : i32
    %14 = arith.andi %12, %13 : i1
    %15 = arith.extui %14 : i1 to i32
    %c0_i32_12 = arith.constant 0 : i32
    %16 = arith.cmpi ne, %15, %c0_i32_12 : i32
    scf.if %16 {
      %17 = tpu.iota {dimensions = array<i32: 1>} : vector<128x128xi32>
      %c32_i32 = arith.constant 32 : i32
      %18 = vector.broadcast %c32_i32 : i32 to vector<128x128xi32>
      %19 = arith.cmpi eq, %17, %18 : vector<128x128xi32>
      %c0_13 = arith.constant 0 : index
      %c0_14 = arith.constant 0 : index
      %20 = vector.load %arg6[%c0_13, %c0_14] : memref<128x128xf32, #tpu.memory_space<vmem>>, vector<128x128xf32>
      %cst_15 = arith.constant 1.000000e+00 : f32
      %21 = vector.broadcast %cst_15 : f32 to vector<128x128xf32>
      %22 = arith.select %19, %21, %20 : vector<128x128xi1>, vector<128x128xf32>
      %23 = arith.truncf %22 : vector<128x128xf32> to vector<128x128xbf16>
      %c0_16 = arith.constant 0 : index
      %c0_17 = arith.constant 0 : index
      %24 = vector.load %arg5[%c0_16, %c0_17] : memref<128x128xbf16, #tpu.memory_space<vmem>>, vector<128x128xbf16>
      tpu.vector_store %arg5[%c0_16, %c0_17], %23 {strides = array<i32>} : memref<128x128xbf16, #tpu.memory_space<vmem>>, vector<128x128xbf16>,
    } else {
    }
    return
  }
  func.func @transform_0(%arg0: i32, %arg1: i32, %arg2: i32) -> (i32, i32) {
    %c0_i32 = arith.constant 0 : i32
    return %arg0, %arg2 : i32, i32
  }
  func.func @transform_1(%arg0: i32, %arg1: i32, %arg2: i32) -> (i32, i32) {
    %c0_i32 = arith.constant 0 : i32
    return %arg2, %arg1 : i32, i32
  }
  func.func @transform_2(%arg0: i32, %arg1: i32, %arg2: i32) -> (i32, i32) {
    %c0_i32 = arith.constant 0 : i32
    return %arg0, %arg1 : i32, i32
  }
}

</mosaic_0001>

<bundles_post_ra>
// kernel: tpu_custom_call.1
= control target key start
LH: loop header
LB: loop body
LE: loop exit
PB: predicated region body
PF: predicated region fallthrough
CT: control target
= control target key end

     0   :  { %7 = vsyncpa [#allocation4], 0  ;;  %s1629_s0 = inlined_call_operand.hbm [shape: bf16[256,128], index: 0, kind: input, shape index: {}]   ;;  %s1630_s1 = inlined_call_operand.hbm [shape: bf16[128,128], index: 1, kind: input, shape index: {}]   ;;  %s1631_s2 = inlined_call_operand.hbm [shape: bf16[256,128], index: 2, kind: output, shape index: {}]  }
   0x1   :  { %9 = vsyncpa [#allocation4 + $0x1], 0 }
   0x2   :  { %10 = vsyncpa [#allocation7], 0 }
   0x3   :  { %11 = vsyncpa [#allocation5], 0 }
   0x4   :  { %13 = vsyncpa [#allocation5 + $0x1], 0  ;;  %s1363_s9 = smov 0   ;;  %s1365_s10 = smov 0  }
   0x5   :  { %s1367_s11 = smov 0   ;;  %s1369_s12 = smov 0  }
   0x6   :  { %s1371_s13 = smov 0   ;;  %s1373_s14 = smov 0  }
   0x7 LB: > { %s845_s15 = sadd.s32 4294967295, %s1339_s14   ;;  %s846_s16 = sadd.s32 4294967294, %s1339_s14   ;;  %s1339_s14 = sphi %s1373_s14, %s19_s14   ;;  %s1335_s13 = sphi %s1371_s13, %s1655_s13   ;;  %s1331_s12 = sphi %s1369_s12, %s1654_s12   ;;  %s1327_s11 = sphi %s1367_s11, %s1653_s11   ;;  %s1323_s10 = sphi %s1365_s10, %s1652_s10   ;;  %s1319_s9 = sphi %s1363_s9, %s1651_s9  }
   0x8   : > { %p60_p0 = scmp.ne.s32.totalorder %s1323_s10, %s1319_s9  ;;  %p1397_p1 = scmp.eq.s32.totalorder %s845_s15, 0 }
   0x9   : > { %p1401_p2 = scmp.eq.s32.totalorder %s845_s15, 1  ;;  %p120_p3 = scmp.eq.s32.totalorder %s846_s16, 1 }
   0xa   : > { %s1636_s17 = scalar_select %p1397_p1, 1, 0 }
   0xb   : > { %s1637_s18 = scalar_select %p1401_p2, 1, 0 }
   0xc   : > { %p1407_p4 = por %p1397_p1, %p60_p0  ;;  %p847_p5 = scmp.ge.s32.totalorder %s1339_s14, 1 }
   0xd   : > { %p1412_p6 = por %p120_p3, %p60_p0  ;;  %p127_p7 = scmp.lt.s32.totalorder %s1339_s14, 3 }
   0xe   : > { %s1638_s19 = scalar_select %p1407_p4, 1, 0 }
   0xf   : > { %s1639_s20 = scalar_select %p1412_p6, 1, 0 }
  0x10   : > { %p1417_p8 = pnand %p847_p5, %p127_p7  ;;  %s1341_s22 = smov [#allocation6]  }
  0x11   : > { %s143_s23 = sshll.u32 %s1341_s22, 4  ;;  %s38_s25 = sadd.s32 1, %s1335_s13  ;;  %s144_s23 = int_to_ptr.vmem [resolvable:$true] %s143_s23 }
  0x12   : > { %s1640_s21 = scalar_select %p1417_p8, 1, 0 }
  0x13   : > { %p1110_p9 = pneg %p1417_p8  ;;  %s1195_s28 = scalar_lea.hbm %s1630_s1, 1024 }
  0x14   : > { %p1196_p12 = scmp.ne.s32.totalorder %s1630_s1, %s1195_s28  ;;  %p1202_p5 = scmp.lt.u32.totalorder %s1195_s28, %s1630_s1 }
  0x15   : > { %p1426_p11 = pnand %p1110_p9, %p1397_p1 }
  0x17   : > { %p1197_p13 = pneg %p1426_p11 }
  0x19   : > { %p1198_p0 = pnand %p1197_p13, %p1196_p12 }
  0x1b   : > { %p1199_p3 = pneg %p1198_p0 }
  0x1d   : > { %p1204_p7 = pnand %p1202_p5, %p1199_p3 }
  0x1f   : > { %1207 = shalt.err (!%p1204_p7)
}
  0x20   : > { %s1208_s5 = scalar_lea.vmem %s144_s23, 1024  ;;  %p1216_p1 = scmp.lt.s32.totalorder %s144_s23, %s144_s23 }
  0x21   : > { %p1209_p9 = scmp.ne.s32.totalorder %s144_s23, %s1208_s5  ;;  %p1217_p4 = scmp.lt.s32.totalorder %s1208_s5, %s1208_s5 }
  0x23   : > { %p1211_p10 = pnand %p1209_p9, %p1197_p13  ;;  %p1218_p8 = por %p1217_p4, %p1216_p1 }
  0x25   : > { %p1212_p6 = pneg %p1211_p10 }
  0x27   : > { %p1219_p2 = pnand %p1218_p8, %p1212_p6 }
  0x29   : > { %1222 = shalt.err (!%p1219_p2)
}
  0x2a   : > { %s1342_s6 = smov 64   ;;  %s1343_s7 = smov 4  }
  0x2b   : > { %1113 = dma.hbm_to_vmem [thread:$0]  (!%p1426_p11), %s1630_s1, 1024, %s144_s23, [#allocation7], %s1342_s6, %s1342_s6, %s1343_s7  }
  0x2c   : > { %p40_p1 = scmp.ge.s32.totalorder %s38_s25, 2  ;;  %s47_s16 = sadd.s32 1, %s1327_s11 }
  0x2d   : > { %p54_p2 = scmp.ne.s32.totalorder %s1327_s11, %s1323_s10  ;;  %p55_p4 = scmp.eq.s32.totalorder %s1339_s14, 0 }
  0x2e   : > { %s1657_s25 = smov (%p40_p1, %s38_s25), 0  ;;  %p1643_p8 = scmp.ne.s32.totalorder %s1637_s18, 0 }
  0x2f   : > { %p1456_p6 = por %p55_p4, %p54_p2  ;;  %s42_s26 = ssub.s32 %s1335_s13, %s1657_s25 }
  0x30   : > { %p1462_p10 = por %p1643_p8, %p54_p2  ;;  %p1123_p12 = scmp.lt.s32.totalorder %s1339_s14, 2 }
  0x31   : > { %p45_p11 = scmp.eq.s32.totalorder %s42_s26, 0  ;;  %s157_s23 = sand.u32 1, %s1327_s11  }
  0x32   : > { %s850_s27 = sshll.u32 %s157_s23, 6  ;;  %s910_s29 = sshll.u32 %s1335_s13, 10 }
  0x33   : > { %s1471_s28 = scalar_select %p45_p11, %s1327_s11, %s47_s16  }
  0x34   : > { %s1477_s4 = scalar_lea.hbm %s1629_s0, %s910_s29  ;;  %s161_s18 = scalar_lea.vmem [#allocation3], %s850_s27 }
  0x35   : > { %s169_s5 = sshll.u32 %s161_s18, 4  ;;  %p1483_p13 = pnand %p1123_p12, %p1456_p6  ;;  %s1479_s5 = int_to_ptr.vmem [resolvable:$true] %s169_s5 }
  0x36   : > { %s1487_s15 = scalar_lea.sflag [#allocation4], %s157_s23  ;;  %s1223_s16 = scalar_lea.hbm %s1477_s4, 1024 }
  0x37   : > { %p1224_p0 = scmp.ne.s32.totalorder %s1477_s4, %s1223_s16  ;;  %p1225_p3 = pneg %p1483_p13 }
  0x38   : > { %s1228_s22 = scalar_lea.hbm %s1629_s0, 2048  ;;  %p1229_p9 = scmp.lt.u32.totalorder %s1477_s4, %s1629_s0 }
  0x39   : > { %p1226_p5 = pnand %p1225_p3, %p1224_p0  ;;  %p1230_p1 = scmp.lt.u32.totalorder %s1228_s22, %s1223_s16 }
  0x3a   : > { %p1232_p4 = scmp.lt.u32.totalorder %s1223_s16, %s1477_s4 }
  0x3b   : > { %p1227_p7 = pneg %p1226_p5  ;;  %p1231_p2 = por %p1230_p1, %p1229_p9 }
  0x3d   : > { %p1233_p6 = por %p1232_p4, %p1231_p2 }
  0x3f   : > { %p1234_p8 = pnand %p1233_p6, %p1227_p7 }
  0x41   : > { %1237 = shalt.err (!%p1234_p8)
}
  0x42   : > { %s1238_s23 = scalar_lea.vmem %s1479_s5, 1024  ;;  %s1344_s3 = smov [#allocation3]  }
  0x43   : > { %p1239_p12 = scmp.ne.s32.totalorder %s1479_s5, %s1238_s23  ;;  %s1243_s18 = sshll.u32 %s1344_s3, 4  ;;  %s1244_s18 = int_to_ptr.vmem [resolvable:$false] %s1243_s18 }
  0x44   : > { %s1245_s26 = scalar_lea.vmem %s1244_s18, 2048  ;;  %p1246_p5 = scmp.lt.s32.totalorder %s1479_s5, %s1244_s18 }
  0x45   : > { %p1241_p11 = pnand %p1239_p12, %p1225_p3  ;;  %p1247_p9 = scmp.lt.s32.totalorder %s1245_s26, %s1238_s23 }
  0x47   : > { %p1242_p0 = pneg %p1241_p11  ;;  %p1248_p1 = por %p1247_p9, %p1246_p5 }
  0x49   : > { %p1249_p2 = pnand %p1248_p1, %p1242_p0 }
  0x4b   : > { %1252 = shalt.err (!%p1249_p2)
}
  0x4c   : > { %1117 = dma.hbm_to_vmem [thread:$0]  (!%p1483_p13), %s1477_s4, 1024, %s1479_s5, %s1487_s15, %s1342_s6, %s1342_s6, %s1343_s7  }
  0x4d   : > { %p1646_p3 = scmp.ne.s32.totalorder %s1640_s21, 0 }
  0x4e   : > { %s1521_s16 = sand.u32 (!%p1646_p3), 1, %s1323_s10   ;;  %p1647_p7 = scmp.ne.s32.totalorder (!%p1646_p3), %s1638_s19, 0 }
  0x4f   : > { %181 = sbr.rel (%p1646_p3) target bundleno = 364 (0x16c), region = 28  ;;  %s854_s27 = sshll.u32 (!%p1646_p3), %s1521_s16, 6 }
  0x50   : > { %s184_s22 = scalar_lea.sflag (!%p1646_p3), [#allocation4], %s1521_s16  ;;  %s1527_s8 = scalar_lea.vmem (!%p1646_p3), [#allocation3], %s854_s27 }
  0x56   : > { %1306 = dma.done.wait (%p1647_p7), %s184_s22, 1024  }
  0x57   : > { %1308 = vsyncadd (%p1647_p7), %s184_s22, 4294966272  ;;  %p1648_p13 = scmp.ne.s32.totalorder %s1636_s17, 0 }
  0x59   : > { %1310 = dma.done.wait (%p1648_p13), [#allocation7], 1024  }
  0x5a   : > { %1312 = vsyncadd (%p1648_p13), [#allocation7], 4294966272  ;;  %v1179_v0 = vld [vmem:[#allocation6] sm:$0xff]   ;;  %v1180_v1 = vld [vmem:[#allocation6 + $0x8] sm:$0xff]   ;;  %v613_v16 = vlaneseq  ;;  %s1555_s17 = scalar_lea.vmem [#allocation8], %s854_s27  ;;  %s943_s19 = sshll.u32 %s1331_s12, 10 }
  0x5b   : > { %1054 = vmatprep.subr.bf16.mxu0 %v1179_v0  ;;  %1086 = vmatprep.subr.bf16.mxu1 %v1179_v0  ;;  %v1181_v2 = vld [vmem:[#allocation6 + $0x10] sm:$0xff]   ;;  %v1182_v3 = vld [vmem:[#allocation6 + $0x18] sm:$0xff]   ;;  %v1187_v4 = vld [vmem:[%s1527_s8] sm:$0xff]   ;;  %s743_s21 = sshll.u32 %s1555_s17, 4  ;;  %s1574_s7 = scalar_lea.hbm %s1631_s2, %s943_s19  ;;  %s1576_s21 = int_to_ptr.vmem [resolvable:$true] %s743_s21 }
  0x5c   : > { %1055 = vmatpush3.bf16.msra.mxu0 %v1179_v0  ;;  %1094 = vmatpush3.bf16.msra.mxu1 %v1179_v0  ;;  %v1188_v5 = vld [vmem:[%s1527_s8 + $0x20] sm:$0xff]   ;;  %v1184_v7 = vld [vmem:[#allocation6 + $0x28] sm:$0xff]   ;;  %v1185_v8 = vld [vmem:[#allocation6 + $0x30] sm:$0xff]   ;;  %v614_v17 = vand.u32 127, %v613_v16  ;;  %s729_s4 = scalar_lea.sflag [#allocation5], %s1521_s16  ;;  %s1253_s5 = scalar_lea.vmem %s1576_s21, 1024 }
  0x5d   : > { %1056 = vmatprep.subr.bf16.mxu0 %v1180_v1  ;;  %1087 = vmatprep.subr.bf16.mxu1 %v1180_v1  ;;  %v1183_v6 = vld [vmem:[#allocation6 + $0x20] sm:$0xff]   ;;  %v1186_v9 = vld [vmem:[#allocation6 + $0x38] sm:$0xff]   ;;  %v1189_v10 = vld [vmem:[%s1527_s8 + $0x8] sm:$0xff]   ;;  %p1254_p4 = scmp.ne.s32.totalorder %s1576_s21, %s1253_s5  ;;  %s1345_s15 = smov [#allocation8]  }
  0x5e   : > { %1070 = vmatprep.mubr.bf16.mxu0 %v1187_v4  ;;  %1078 = vmatprep.mubr.bf16.mxu1 %v1188_v5  ;;  %v1190_v11 = vld [vmem:[%s1527_s8 + $0x28] sm:$0xff]   ;;  %v1191_v12 = vld [vmem:[%s1527_s8 + $0x10] sm:$0xff]   ;;  %v1193_v14 = vld [vmem:[%s1527_s8 + $0x18] sm:$0xff]   ;;  %vm615_vm0 = vcmp.eq.s32.totalorder %v614_v17, 32  ;;  %s1257_s29 = sshll.u32 %s1345_s15, 4  ;;  %s1258_s29 = int_to_ptr.vmem [resolvable:$false] %s1257_s29 }
  0x5f   : > { %v1192_v13 = vld [vmem:[%s1527_s8 + $0x30] sm:$0xff]   ;;  %v1194_v15 = vld [vmem:[%s1527_s8 + $0x38] sm:$0xff]   ;;  %p1255_p6 = pnand %p1254_p4, %p1462_p10  ;;  %s1259_s30 = scalar_lea.vmem %s1258_s29, 2048 }
  0x60   : > { %1057 = vmatpush3.bf16.msra.mxu0 %v1180_v1  ;;  %1095 = vmatpush3.bf16.msra.mxu1 %v1180_v1  ;;  %p1260_p12 = scmp.lt.s32.totalorder %s1576_s21, %s1258_s29  ;;  %p1261_p11 = scmp.lt.s32.totalorder %s1259_s30, %s1253_s5 }
  0x61   : > { %1058 = vmatprep.subr.bf16.mxu0 %v1181_v2  ;;  %1088 = vmatprep.subr.bf16.mxu1 %v1181_v2  ;;  %p1256_p8 = pneg %p1255_p6 }
  0x62   : > { %p1262_p0 = por %p1261_p11, %p1260_p12 }
  0x64   : > { %1059 = vmatpush3.bf16.msra.mxu0 %v1181_v2  ;;  %1096 = vmatpush3.bf16.msra.mxu1 %v1181_v2  ;;  %p1263_p5 = pnand %p1262_p0, %p1256_p8 }
  0x65   : > { %1060 = vmatprep.subr.bf16.mxu0 %v1182_v3  ;;  %1089 = vmatprep.subr.bf16.mxu1 %v1182_v3 }
  0x68   : > { %1061 = vmatpush3.bf16.msra.mxu0 %v1182_v3  ;;  %1097 = vmatpush3.bf16.msra.mxu1 %v1182_v3 }
  0x69   : > { %1062 = vmatprep.subr.bf16.mxu0 %v1183_v6  ;;  %1090 = vmatprep.subr.bf16.mxu1 %v1183_v6 }
  0x6c   : > { %1063 = vmatpush3.bf16.msra.mxu0 %v1183_v6  ;;  %1098 = vmatpush3.bf16.msra.mxu1 %v1183_v6 }
  0x6d   : > { %1064 = vmatprep.subr.bf16.mxu0 %v1184_v7  ;;  %1091 = vmatprep.subr.bf16.mxu1 %v1184_v7 }
  0x70   : > { %1065 = vmatpush3.bf16.msra.mxu0 %v1184_v7  ;;  %1099 = vmatpush3.bf16.msra.mxu1 %v1184_v7 }
  0x71   : > { %1066 = vmatprep.subr.bf16.mxu0 %v1185_v8  ;;  %1092 = vmatprep.subr.bf16.mxu1 %v1185_v8 }
  0x74   : > { %1067 = vmatpush3.bf16.msra.mxu0 %v1185_v8  ;;  %1100 = vmatpush3.bf16.msra.mxu1 %v1185_v8 }
  0x75   : > { %1068 = vmatprep.subr.bf16.mxu0 %v1186_v9  ;;  %1093 = vmatprep.subr.bf16.mxu1 %v1186_v9 }
  0x78   : > { %1069 = vmatpush3.bf16.msra.mxu0 %v1186_v9  ;;  %1101 = vmatpush3.bf16.msra.mxu1 %v1186_v9 }
  0x7b   : > { %1071 = vmatmul.mubr.bf16.vlgmr.msra.gmra.mrb[0].mxu0 %v1189_v10  ;;  %1079 = vmatmul.mubr.bf16.vlgmr.msra.gmra.mrb[0].mxu1 %v1190_v11 }
  0x7c   : > { %1074 = vmatprep.mubr.bf16.mxu0 %v1191_v12  ;;  %1082 = vmatprep.mubr.bf16.mxu1 %v1192_v13 }
  0x83   : > { %1075 = vmatmul.mubr.bf16.gmra.mrb[4].mxu0 %v1193_v14  ;;  %1083 = vmatmul.mubr.bf16.gmra.mrb[4].mxu1 %v1194_v15 }
 0x14e   : > { %v1072_v18 = vpop.f32.mrb[0].mxu0  ;;  %v1080_v19 = vpop.f32.mrb[0].mxu1 }
 0x14f   : > { %v414_v20 = vpop.f32.mrb[1].mxu0  ;;  %v446_v21 = vpop.f32.mrb[1].mxu1  ;;  %v634_v22 = vsel %vm615_vm0, 1.0, %v1072_v18  ;;  %v642_v23 = vsel %vm615_vm0, 1.0, %v1080_v19 }
 0x150   : > { %v1073_v24 = vpop.f32.mrb[2].mxu0  ;;  %v1081_v25 = vpop.f32.mrb[2].mxu1  ;;  %v632_v26 = vsel %vm615_vm0, 1.0, %v414_v20  ;;  %v640_v27 = vsel %vm615_vm0, 1.0, %v446_v21 }
 0x151   : > { %v635_v28 = vsel %vm615_vm0, 1.0, %v1073_v24  ;;  %v643_v29 = vsel %vm615_vm0, 1.0, %v1081_v25  ;;  %v417_v30 = vpop.f32.mrb[3].mxu0  ;;  %v449_v31 = vpop.f32.mrb[3].mxu1 }
 0x152   : > { %v992_v32 = vpack.c.bf16 %v635_v28, %v634_v22  ;;  %v1012_v33 = vpack.c.bf16 %v643_v29, %v642_v23  ;;  %v633_v34 = vsel %vm615_vm0, 1.0, %v417_v30  ;;  %v641_v35 = vsel %vm615_vm0, 1.0, %v449_v31 }
 0x153   : > { %v987_v36 = vpack.c.bf16 %v633_v34, %v632_v26  ;;  %v1007_v37 = vpack.c.bf16 %v641_v35, %v640_v27 }
 0x154   : > { %1031 = vst [vmem:[%s1555_s17 + $0x8] sm:$0xff] %v992_v32   ;;  %1035 = vst [vmem:[%s1555_s17 + $0x28] sm:$0xff] %v1012_v33  }
 0x155   : > { %988 = vst [vmem:[%s1555_s17] sm:$0xff] %v987_v36   ;;  %1034 = vst [vmem:[%s1555_s17 + $0x20] sm:$0xff] %v1007_v37  }
 0x156   : > { %v1076_v38 = vpop.f32.mrb[4].mxu0  ;;  %v1084_v39 = vpop.f32.mrb[4].mxu1 }
 0x157   : > { %v430_v40 = vpop.f32.mrb[5].mxu0  ;;  %v462_v41 = vpop.f32.mrb[5].mxu1  ;;  %v638_v42 = vsel %vm615_vm0, 1.0, %v1076_v38  ;;  %v646_v43 = vsel %vm615_vm0, 1.0, %v1084_v39 }
 0x158   : > { %v1077_v44 = vpop.f32.mrb[6].mxu0  ;;  %v1085_v45 = vpop.f32.mrb[6].mxu1  ;;  %v636_v46 = vsel %vm615_vm0, 1.0, %v430_v40  ;;  %v644_v47 = vsel %vm615_vm0, 1.0, %v462_v41 }
 0x159   : > { %v639_v48 = vsel %vm615_vm0, 1.0, %v1077_v44  ;;  %v647_v49 = vsel %vm615_vm0, 1.0, %v1085_v45  ;;  %v433_v50 = vpop.f32.mrb[7].mxu0  ;;  %v465_v51 = vpop.f32.mrb[7].mxu1 }
 0x15a   : > { %v1002_v52 = vpack.c.bf16 %v639_v48, %v638_v42  ;;  %v1022_v53 = vpack.c.bf16 %v647_v49, %v646_v43  ;;  %v637_v54 = vsel %vm615_vm0, 1.0, %v433_v50  ;;  %v645_v55 = vsel %vm615_vm0, 1.0, %v465_v51 }
 0x15b   : > { %v997_v56 = vpack.c.bf16 %v637_v54, %v636_v46  ;;  %v1017_v57 = vpack.c.bf16 %v645_v55, %v644_v47 }
 0x15c   : > { %1033 = vst [vmem:[%s1555_s17 + $0x18] sm:$0xff] %v1002_v52   ;;  %1037 = vst [vmem:[%s1555_s17 + $0x38] sm:$0xff] %v1022_v53  }
 0x15d   : > { %1032 = vst [vmem:[%s1555_s17 + $0x10] sm:$0xff] %v997_v56   ;;  %1036 = vst [vmem:[%s1555_s17 + $0x30] sm:$0xff] %v1017_v57  }
 0x15e   : > { %1266 = shalt.err (!%p1263_p5)
}
 0x15f   : > { %s1267_s23 = scalar_lea.hbm %s1574_s7, 1024  ;;  %s1271_s26 = scalar_lea.hbm %s1631_s2, 2048 }
 0x160   : > { %p1268_p9 = scmp.ne.s32.totalorder %s1574_s7, %s1267_s23  ;;  %p1272_p3 = scmp.lt.u32.totalorder %s1574_s7, %s1631_s2 }
 0x161   : > { %p1273_p7 = scmp.lt.u32.totalorder %s1271_s26, %s1267_s23  ;;  %p1275_p4 = scmp.lt.u32.totalorder %s1267_s23, %s1574_s7 }
 0x162   : > { %p1269_p1 = pnand %p1268_p9, %p1462_p10 }
 0x163   : > { %p1274_p13 = por %p1273_p7, %p1272_p3 }
 0x164   : > { %p1270_p2 = pneg %p1269_p1 }
 0x165   : > { %p1276_p6 = por %p1275_p4, %p1274_p13 }
 0x167   : > { %p1277_p8 = pnand %p1276_p6, %p1270_p2 }
 0x169   : > { %1280 = shalt.err (!%p1277_p8)
}
 0x16a   : > { %s1346_s8 = smov 64   ;;  %s1347_s17 = smov 4  }
 0x16b   : > { %1108 = dma.vmem_to_hbm [thread:$0]  (%p1462_p10), %s1576_s21, 1024, %s1574_s7, %s729_s4, %s1346_s8, %s1346_s8, %s1347_s17  }
 0x16c PF: > { %s758_s19 = sand.u32 1, %s1319_s9   ;;  %p1649_p12 = scmp.ne.s32.totalorder %s1639_s20, 0 }
 0x16d   : > { %p1650_p11 = scmp.ge.s32.totalorder %s1339_s14, 2  ;;  %s759_s12 = scalar_lea.sflag [#allocation5], %s758_s19 }
 0x16f   : > { %p1119_p0 = pnand %p1650_p11, %p1649_p12 }
 0x171   : > { %1314 = dma.done.wait (!%p1119_p0), %s759_s12, 1024  }
 0x172   : > { %1316 = vsyncadd (!%p1119_p0), %s759_s12, 4294966272  ;;  %s19_s14 = sadd.s32 1, %s1339_s14   ;;  %s1651_s9 = smov %s1323_s10 }
 0x173   : > { %p16_p5 = scmp.ge.s32.totalorder %s19_s14, 4   ;;  %s1652_s10 = smov %s1327_s11 }
 0x174   : > { %s1653_s11 = smov %s1471_s28  ;;  %s1654_s12 = smov %s1335_s13 }
 0x175   : > { %s1655_s13 = smov %s1657_s25  ;;  %18 = sbr.rel (!%p16_p5) target bundleno = 7 (0x7), region = 90 }
 0x17c   :  { %764 = vsyncpa [#allocation4], 1 }
 0x17d   :  { %766 = vsyncpa [#allocation4 + $0x1], 1 }
 0x17e   :  { %767 = vsyncpa [#allocation7], 1 }
 0x17f   :  { %768 = vsyncpa [#allocation5], 1 }
 0x180   :  { %770 = vsyncpa [#allocation5 + $0x1], 1 }

</bundles_post_ra>
